<compile_context>
chip_gen: v5e
topology: v5e:2x2
jax: 0.10.0
libtpu: 0.0.40
codegen_flags: <defaults>
</compile_context>

<pallas_src>
import jax
import jax.numpy as jnp
from jax.experimental import pallas as pl
from jax.experimental.pallas import tpu as pltpu


# ---------------------------------------------------------------------------
# Pallas kernel: fused 2-layer MLP + head, action injected at layer 1.
# Transposed layout: batch on the 128-lane axis everywhere.
# ---------------------------------------------------------------------------
def _model_error_kernel(sa_ref, wbig_ref, w1s_ref, wh_ref, bh_ref, out_ref):
    sat = sa_ref[...].astype(jnp.float32)                     # (Kin, TB)

    # One MXU push against the merged [W0 ; W1a] weight.  Biases live in the
    # f32 ones-row column, so rows [0:F1] are exactly W0 @ s + b0 and rows
    # [F1:] are exactly W1a @ a + b1.
    y = jnp.dot(wbig_ref[...], sat,
                preferred_element_type=jnp.float32)           # (F1+F2, TB)

    f1 = w1s_ref.shape[1]
    h0 = jnp.maximum(y[:f1, :], 0.0)                          # relu(W0 s + b0)

    # layer 1: relu(W1s @ h0 + W1a @ a + b1) — the second term is y[F1:].
    h1 = jnp.dot(w1s_ref[...], h0,
                 preferred_element_type=jnp.float32) + y[f1:, :]
    h1 = jnp.maximum(h1, 0.0)                                 # (F2, TB)

    # head (out_features == 1): broadcast-mul + sublane reduce (VPU/XLU),
    # stored as a lane-dense (1, TB) row; bh is a scalar in SMEM.
    out_ref[...] = (jnp.sum(h1 * wh_ref[...], axis=0, keepdims=True)
                    + bh_ref[0])


def _round_up(x, m):
    return ((x + m - 1) // m) * m


def model_error_forward(state, action, params, *, block_b=4096,
                        stream_dtype=jnp.float32):
    """Wrapper: all param packing / transposing / padding is glue; compute is
    in the kernel."""
    w0, b0 = params["w0"], params["b0"]       # (F1, S),       (F1,)
    w1, b1 = params["w1"], params["b1"]       # (F2, F1 + A),  (F2,)
    wh, bh = params["wh"], params["bh"]       # (1, F2),       (1,)

    B, S = state.shape
    A = action.shape[1]
    F1 = w0.shape[0]
    F2 = w1.shape[0]
    Kin = S + A + 1                           # [state ; action ; ones]

    # --- batch tiling: batch is the lane axis, so tiles are multiples of 128 -
    n_chunks = _round_up(B, 128) // 128
    max_chunks = max(_round_up(block_b, 128) // 128, 1)
    tb_chunks = min(max_chunks, n_chunks)
    if tb_chunks >= n_chunks and n_chunks >= 2:
        # keep >= 2 parallel grid steps so both v7x TensorCores get work
        # (harmless on single-TC v5e/v6e).
        tb_chunks = (n_chunks + 1) // 2
    TB = tb_chunks * 128
    nb = -(-n_chunks // tb_chunks)            # ceil
    B_pad = nb * TB

    # --- one transposed, fused input stream: saT = [state^T; action^T; 1] ----
    saT = jnp.concatenate(
        [state.astype(jnp.float32).T,
         action.astype(jnp.float32).T,
         jnp.ones((1, B), jnp.float32)], axis=0).astype(stream_dtype)  # (Kin,B)
    if B_pad != B:
        saT = jnp.pad(saT, ((0, 0), (0, B_pad - B)))

    # --- resident f32 weights; b0/b1 folded into the f32 ones-row column -----
    w_big = jnp.zeros((F1 + F2, Kin), jnp.float32)
    w_big = w_big.at[:F1, :S].set(w0.astype(jnp.float32))
    w_big = w_big.at[:F1, S + A].set(b0.astype(jnp.float32))
    w_big = w_big.at[F1:, S:S + A].set(w1[:, F1:].astype(jnp.float32))
    w_big = w_big.at[F1:, S + A].set(b1.astype(jnp.float32))
    w1s = w1[:, :F1].astype(jnp.float32)                 # (F2, F1)
    wh_col = wh.reshape(F2, 1).astype(jnp.float32)       # (F2, 1)
    bh_s = bh.reshape(1).astype(jnp.float32)             # SMEM scalar

    out = pl.pallas_call(
        _model_error_kernel,
        out_shape=jax.ShapeDtypeStruct((1, B_pad), jnp.float32),
        grid=(nb,),
        in_specs=[
            pl.BlockSpec((Kin, TB), lambda i: (0, i)),        # streamed saT
            pl.BlockSpec((F1 + F2, Kin), lambda i: (0, 0)),   # resident weights
            pl.BlockSpec((F2, F1), lambda i: (0, 0)),
            pl.BlockSpec((F2, 1), lambda i: (0, 0)),
            pl.BlockSpec(memory_space=pltpu.MemorySpace.SMEM),  # bh scalar
        ],
        out_specs=pl.BlockSpec((1, TB), lambda i: (0, i)),    # lane-dense out
        compiler_params=pltpu.CompilerParams(
            dimension_semantics=("parallel",)),
    )(saT, w_big, w1s, wh_col, bh_s)

    # padded columns carry garbage (== bh); drop them here.
    return out[0, :B].reshape(B, 1)


# ---------------------------------------------------------------------------
# Deterministic parameter init (PyTorch nn.Linear-style uniform ±1/sqrt(fan_in))
# ---------------------------------------------------------------------------
def init_params(key, state_size, num_actions, layers_features):
    F1, F2 = layers_features
    ks = jax.random.split(key, 6)

    def linear_init(kw, kb, out_f, in_f):
        bound = 1.0 / jnp.sqrt(jnp.float32(in_f))
        w = jax.random.uniform(kw, (out_f, in_f), jnp.float32, -bound, bound)
        b = jax.random.uniform(kb, (out_f,), jnp.float32, -bound, bound)
        return w, b

    w0, b0 = linear_init(ks[0], ks[1], F1, state_size)          # layer 0
    w1, b1 = linear_init(ks[2], ks[3], F2, F1 + num_actions)    # layer 1 (+act)
    wh, bh = linear_init(ks[4], ks[5], 1, F2)                   # head
    return dict(w0=w0, b0=b0, w1=w1, b1=b1, wh=wh, bh=bh)


def reference_forward(state, action, params):
    h0 = jnp.maximum(state @ params["w0"].T + params["b0"], 0.0)
    h1 = jnp.maximum(jnp.concatenate([h0, action], axis=1) @ params["w1"].T
                     + params["b1"], 0.0)
    return h1 @ params["wh"].T + params["bh"]


if __name__ == "__main__":
    state_size = 8
    num_actions = 4
    layers_features = [32, 32]

    key = jax.random.PRNGKey(0)
    k_state, k_action, k_params, k_state2, k_action2 = jax.random.split(key, 5)
    params = init_params(k_params, state_size, num_actions, layers_features)

    # --- small case (B=2), exactly matching the module's typical usage -------
    B = 2
    state = jax.random.normal(k_state, (B, state_size), jnp.float32)
    act_idx = jax.random.randint(k_action, (B,), 0, num_actions)
    action = jax.nn.one_hot(act_idx, num_actions, dtype=jnp.float32)

    out = jax.block_until_ready(model_error_forward(state, action, params))
    ref = reference_forward(state, action, params)
    assert out.shape == (B, 1)
    assert jnp.allclose(out, ref, atol=1e-4, rtol=1e-4), (out, ref)

    # --- multi-tile case exercising the batch grid + lane padding path -------
    B2 = 300
    state2 = jax.random.normal(k_state2, (B2, state_size), jnp.float32)
    act_idx2 = jax.random.randint(k_action2, (B2,), 0, num_actions)
    action2 = jax.nn.one_hot(act_idx2, num_actions, dtype=jnp.float32)

    out2 = jax.block_until_ready(
        model_error_forward(state2, action2, params, block_b=128))
    ref2 = reference_forward(state2, action2, params)
    assert out2.shape == (B2, 1)
    assert jnp.allclose(out2, ref2, atol=1e-4, rtol=1e-4)

    # --- default (large-tile, auto 2-step) path on the same data -------------
    out2b = jax.block_until_ready(model_error_forward(state2, action2, params))
    assert jnp.allclose(out2b, ref2, atol=1e-4, rtol=1e-4)

    # --- bf16 streaming path (input-HBM win on v6e/v7x); weights/accum stay f32
    out3 = jax.block_until_ready(
        model_error_forward(state2, action2, params, block_b=128,
                            stream_dtype=jnp.bfloat16))
    assert jnp.allclose(out3, ref2, atol=5e-2, rtol=5e-2)

    print("KERNEL_OK")
</pallas_src>

<mosaic_0001>
module attributes {stable_mosaic.version = 11 : i64} {
  func.func @_model_error_kernel(%arg0: i32, %arg1: memref<13x128xf32, #tpu.memory_space<vmem>>, %arg2: memref<64x13xf32, #tpu.memory_space<vmem>>, %arg3: memref<32x32xf32, #tpu.memory_space<vmem>>, %arg4: memref<32x1xf32, #tpu.memory_space<vmem>>, %arg5: memref<1xf32, #tpu.memory_space<smem>>, %arg6: memref<1x128xf32, #tpu.memory_space<vmem>>) attributes {dimension_semantics = [#tpu.dimension_semantics<parallel>], iteration_bounds = array<i64: 1>, scalar_prefetch = 0 : i64, scratch_operands = 0 : i64, tpu.core_type = #tpu.core_type<tc>, window_params = [{transform_indices = @transform_0, window_bounds = array<i64: 13, 128>}, {pipeline_mode = #tpu.pipeline_mode<synchronous>, transform_indices = @transform_1, window_bounds = array<i64: 64, 13>}, {pipeline_mode = #tpu.pipeline_mode<synchronous>, transform_indices = @transform_2, window_bounds = array<i64: 32, 32>}, {pipeline_mode = #tpu.pipeline_mode<synchronous>, transform_indices = @transform_3, window_bounds = array<i64: 32, 1>}, {transform_indices = @transform_4, window_bounds = array<i64: 1>}, {transform_indices = @transform_5, window_bounds = array<i64: 1, 128>}]} {
    %c0 = arith.constant 0 : index
    %c0_0 = arith.constant 0 : index
    %0 = vector.load %arg1[%c0, %c0_0] : memref<13x128xf32, #tpu.memory_space<vmem>>, vector<13x128xf32>
    %c0_1 = arith.constant 0 : index
    %c0_2 = arith.constant 0 : index
    %1 = vector.load %arg2[%c0_1, %c0_2] : memref<64x13xf32, #tpu.memory_space<vmem>>, vector<64x13xf32>
    %cst = arith.constant dense<0.000000e+00> : vector<64x128xf32>
    %2 = tpu.matmul %1, %0, %cst {dimension_numbers = #tpu.dot_dimension_numbers<[1], [0], [0], [1], [0, 0, 1, 1], [], []>} : vector<64x13xf32>, vector<13x128xf32>, vector<64x128xf32> -> vector<64x128xf32>
    %3 = vector.extract_strided_slice %2 {offsets = [0, 0], sizes = [32, 128], strides = [1, 1]} : vector<64x128xf32> to vector<32x128xf32>
    %cst_3 = arith.constant 0.000000e+00 : f32
    %4 = vector.broadcast %cst_3 : f32 to vector<32x128xf32>
    %5 = arith.maximumf %3, %4 : vector<32x128xf32>
    %c0_4 = arith.constant 0 : index
    %c0_5 = arith.constant 0 : index
    %6 = vector.load %arg3[%c0_4, %c0_5] : memref<32x32xf32, #tpu.memory_space<vmem>>, vector<32x32xf32>
    %cst_6 = arith.constant dense<0.000000e+00> : vector<32x128xf32>
    %7 = tpu.matmul %6, %5, %cst_6 {dimension_numbers = #tpu.dot_dimension_numbers<[1], [0], [0], [1], [0, 0, 1, 1], [], []>} : vector<32x32xf32>, vector<32x128xf32>, vector<32x128xf32> -> vector<32x128xf32>
    %8 = vector.extract_strided_slice %2 {offsets = [32, 0], sizes = [32, 128], strides = [1, 1]} : vector<64x128xf32> to vector<32x128xf32>
    %9 = arith.addf %7, %8 : vector<32x128xf32>
    %cst_7 = arith.constant 0.000000e+00 : f32
    %10 = vector.broadcast %cst_7 : f32 to vector<32x128xf32>
    %11 = arith.maximumf %9, %10 : vector<32x128xf32>
    %c0_8 = arith.constant 0 : index
    %c0_9 = arith.constant 0 : index
    %12 = vector.load %arg4[%c0_8, %c0_9] : memref<32x1xf32, #tpu.memory_space<vmem>>, vector<32x1xf32>
    %13 = vector.broadcast %12 : vector<32x1xf32> to vector<32x128xf32>
    %14 = arith.mulf %11, %13 : vector<32x128xf32>
    %cst_10 = arith.constant dense<0.000000e+00> : vector<128xf32>
    %15 = vector.multi_reduction <add>, %14, %cst_10 [0] : vector<32x128xf32> to vector<128xf32>
    %16 = vector.shape_cast %15 : vector<128xf32> to vector<1x128xf32>
    %c0_11 = arith.constant 0 : index
    %17 = memref.load %arg5[%c0_11] : memref<1xf32, #tpu.memory_space<smem>>
    %18 = vector.broadcast %17 : f32 to vector<1x128xf32>
    %19 = arith.addf %16, %18 : vector<1x128xf32>
    %c0_12 = arith.constant 0 : index
    %c0_13 = arith.constant 0 : index
    %20 = vector.load %arg6[%c0_12, %c0_13] : memref<1x128xf32, #tpu.memory_space<vmem>>, vector<1x128xf32>
    tpu.vector_store %arg6[%c0_12, %c0_13], %19 {strides = array<i32>} : memref<1x128xf32, #tpu.memory_space<vmem>>, vector<1x128xf32>,
    return
  }
  func.func @transform_0(%arg0: i32) -> (i32, i32) {
    %c0_i32 = arith.constant 0 : i32
    %c0_i32_0 = arith.constant 0 : i32
    return %c0_i32, %arg0 : i32, i32
  }
  func.func @transform_1(%arg0: i32) -> (i32, i32) {
    %c0_i32 = arith.constant 0 : i32
    %c0_i32_0 = arith.constant 0 : i32
    %c0_i32_1 = arith.constant 0 : i32
    return %c0_i32, %c0_i32_0 : i32, i32
  }
  func.func @transform_2(%arg0: i32) -> (i32, i32) {
    %c0_i32 = arith.constant 0 : i32
    %c0_i32_0 = arith.constant 0 : i32
    %c0_i32_1 = arith.constant 0 : i32
    return %c0_i32, %c0_i32_0 : i32, i32
  }
  func.func @transform_3(%arg0: i32) -> (i32, i32) {
    %c0_i32 = arith.constant 0 : i32
    %c0_i32_0 = arith.constant 0 : i32
    %c0_i32_1 = arith.constant 0 : i32
    return %c0_i32, %c0_i32_0 : i32, i32
  }
  func.func @transform_4(%arg0: i32) -> i32 {
    %c0_i32 = arith.constant 0 : i32
    %c0_i32_0 = arith.constant 0 : i32
    return %c0_i32 : i32
  }
  func.func @transform_5(%arg0: i32) -> (i32, i32) {
    %c0_i32 = arith.constant 0 : i32
    %c0_i32_0 = arith.constant 0 : i32
    return %c0_i32, %arg0 : i32, i32
  }
}

</mosaic_0001>

<bundles_post_ra>
// kernel: tpu_custom_call.1
= control target key start
LH: loop header
LB: loop body
LE: loop exit
PB: predicated region body
PF: predicated region fallthrough
CT: control target
= control target key end

     0   :  { %vm57_vm0 = vcmask 1044480   ;;  %vm32_vm1 = vcmask 105472   ;;  %s364_s0 = inlined_call_operand.vmem [shape: f32[13,128], index: 0, kind: input, shape index: {}]   ;;  %s365_s1 = inlined_call_operand.vmem [shape: f32[64,13], index: 1, kind: input, shape index: {}]   ;;  %s366_s2 = inlined_call_operand.vmem [shape: f32[32,32], index: 2, kind: input, shape index: {}]   ;;  %s367_s3 = inlined_call_operand.vmem [shape: f32[32,1], index: 3, kind: input, shape index: {}]   ;;  %s368_s4 = inlined_call_operand.<no memory space> [shape: f32[1], index: 4, kind: input, shape index: {}]   ;;  %s369_s5 = inlined_call_operand.hbm [shape: f32[1,128], index: 5, kind: output, shape index: {}]  }
   0x1   :  { %v23_v0 = vld [vmem:[%s364_s0 + $0x8] sm:$0x1f]  ;;  %v22_v1 = vld [vmem:[%s364_s0] sm:$0xff]  ;;  %v27_v3 = vld [vmem:[%s365_s1 + $0x18] sm:$0xff] }
   0x2   :  { %213 = vmatpush.msk.msra.mxu0 %vm57_vm0, %v23_v0  ;;  %v24_v2 = vld [vmem:[%s365_s1] sm:$0xff]  ;;  %226 = vmatpush.msk.msra.mxu2 %vm57_vm0, %v23_v0 }
   0x3   :  { %227 = vmatpush.msk.msra.mxu3 %vm57_vm0, %v23_v0 }
   0x4   :  { %11 = vsyncpa [#allocation4], 0  ;;  %76 = vmatpush.msra.mxu0 %v22_v1  ;;  %228 = vmatpush.msra.mxu2 %v22_v1  ;;  %v25_v4 = vld [vmem:[%s365_s1 + $0x8] sm:$0xff]  ;;  %v26_v5 = vld [vmem:[%s365_s1 + $0x10] sm:$0xff]  ;;  %v264_v12 = vmov 0   ;;  %vm110_vm2 = vcmask 261120   ;;  %v194_v59 = vstv %s368_s4 }
   0x5   :  { %214 = vmatmul.msk.f32.vlgmr.msra.gmra.mxu0 %vm32_vm1, %v24_v2  ;;  %217 = vmatmul.msk.f32.vlgmr.msra.gmra.mxu2 %vm32_vm1, %v27_v3  ;;  %v28_v6 = vld [vmem:[%s365_s1 + $0x20] sm:$0xff]  ;;  %v29_v7 = vld [vmem:[%s365_s1 + $0x28] sm:$0xff]  ;;  %v30_v8 = vld [vmem:[%s365_s1 + $0x30] sm:$0xff]  ;;  %s265_s26 = smov [#allocation3]   ;;  %s204_s30 = sshll.u32 %s369_s5, 4  ;;  %s205_s30 = int_to_ptr.hbm [resolvable:$true] %s204_s30 }
   0x6   :  { %229 = vmatpush.msra.mxu3 %v22_v1  ;;  %v31_v9 = vld [vmem:[%s365_s1 + $0x38] sm:$0xff]  ;;  %v156_v11 = vld [vmem:[%s367_s3] sm:$0xff]  ;;  %236 = vset.pattern.permute.xlu0 %v264_v12  ;;  %v158_v16 = vld [vmem:[%s367_s3 + $0x10] sm:$0xff]  ;;  %s202_s27 = sshll.u32 %s265_s26, 4  ;;  %s203_s27 = int_to_ptr.vmem [resolvable:$true] %s202_s27 }
   0x7   :  { %218 = vmatmul.msk.f32.vlgmr.msra.gmra.mxu3 %vm32_vm1, %v28_v6  ;;  %237 = vset.pattern.permute.xlu1 %v264_v12  ;;  %v157_v17 = vld [vmem:[%s367_s3 + $0x8] sm:$0xff]  ;;  %v159_v18 = vld [vmem:[%s367_s3 + $0x18] sm:$0xff]  ;;  %v106_v23 = vld [vmem:[%s366_s2] sm:$0xff] }
   0x8   :  { %162 = vperm.xlu0 %236, %v156_v11   ;;  %172 = vperm.xlu1 %237, %v158_v16   ;;  %v109_v24 = vld [vmem:[%s366_s2 + $0x18] sm:$0xff]  ;;  %v107_v25 = vld [vmem:[%s366_s2 + $0x8] sm:$0xff]  ;;  %v108_v26 = vld [vmem:[%s366_s2 + $0x10] sm:$0xff] }
   0xd   :  { %215 = vmatmul.msk.f32.gmra.mxu0 %vm32_vm1, %v25_v4 }
   0xf   :  { %219 = vmatmul.msk.f32.gmra.mxu3 %vm32_vm1, %v29_v7 }
  0x10   :  { %167 = vperm.xlu0 %236, %v157_v17   ;;  %177 = vperm.xlu1 %237, %v159_v18  }
  0x15   :  { %216 = vmatmul.msk.f32.gmra.mxu0 %vm32_vm1, %v26_v5 }
  0x17   :  { %220 = vmatmul.msk.f32.gmra.mxu3 %vm32_vm1, %v30_v8 }
  0x1f   :  { %221 = vmatmul.msk.f32.gmra.mxu3 %vm32_vm1, %v31_v9 }
  0x7a   :  { %v163_v31 = vpop.permute.xlu0 %162  ;;  %v173_v34 = vpop.permute.xlu1 %172 }
  0x82   :  { %v78_v10 = vpop.f32.mrf.mxu0  ;;  %v168_v41 = vpop.permute.xlu0 %167 }
  0x83   :  { %v102_v22 = vmax.f32 %v78_v10, 0.0  ;;  %v178_v48 = vpop.permute.xlu1 %177 }
  0x88   :  { %v87_v13 = vpop.f32.mrf.mxu2 }
  0x89   :  { %v105_v14 = vmax.f32 %v87_v13, 0.0 }
  0x8a   :  { %v81_v15 = vpop.f32.mrf.mxu0  ;;  %v90_v27 = vpop.f32.mrf.mxu3 }
  0x8b   :  { %135 = vmatpush.msra.mxu1 %v105_v14  ;;  %230 = vmatpush.msrb.mxu2 %v105_v14  ;;  %v103_v21 = vmax.f32 %v81_v15, 0.0 }
  0x92   :  { %v84_v19 = vpop.f32.mrf.mxu0  ;;  %v93_v28 = vpop.f32.mrf.mxu3 }
  0x93   :  { %v104_v20 = vmax.f32 %v84_v19, 0.0 }
  0x95   :  { %136 = vmatpush.msra.mxu1 %v104_v20  ;;  %231 = vmatpush.msrb.mxu2 %v104_v20 }
  0x97   :  { %137 = vmatpush.msra.mxu1 %v103_v21  ;;  %232 = vmatpush.msrb.mxu2 %v103_v21 }
  0x99   :  { %138 = vmatpush.msra.mxu1 %v102_v22  ;;  %233 = vmatpush.msrb.mxu2 %v102_v22 }
  0x9a   :  { %222 = vmatmul.msk.f32.vlgmr.msra.gmra.mxu1 %vm110_vm2, %v106_v23  ;;  %225 = vmatmul.msk.f32.vlgmr.msrb.gmra.mxu2 %vm110_vm2, %v109_v24  ;;  %v96_v30 = vpop.f32.mrf.mxu3 }
  0xa2   :  { %223 = vmatmul.msk.f32.gmra.mxu1 %vm110_vm2, %v107_v25  ;;  %v99_v36 = vpop.f32.mrf.mxu3 }
  0xaa   :  { %224 = vmatmul.msk.f32.gmra.mxu1 %vm110_vm2, %v108_v26 }
 0x117   :  { %v140_v29 = vpop.f32.mrf.mxu1 }
 0x118   :  { %v141_v35 = vadd.f32 %v140_v29, %v90_v27 }
 0x11a   :  { %v152_v39 = vmax.f32 %v141_v35, 0.0 }
 0x11c   :  { %v180_v45 = vmul.f32 %v163_v31, %v152_v39 }
 0x11d   :  { %v149_v37 = vpop.f32.mrf.mxu2 }
 0x11e   :  { %v150_v40 = vadd.f32 %v149_v37, %v99_v36 }
 0x11f   :  { %v143_v32 = vpop.f32.mrf.mxu1 }
 0x120   :  { %v144_v33 = vadd.f32 %v143_v32, %v93_v28  ;;  %v155_v46 = vmax.f32 %v150_v40, 0.0 }
 0x122   :  { %v153_v38 = vmax.f32 %v144_v33, 0.0  ;;  %v183_v51 = vmul.f32 %v178_v48, %v155_v46 }
 0x124   :  { %v181_v43 = vmul.f32 %v168_v41, %v153_v38 }
 0x126   :  { %v184_v49 = vadd.f32 %v181_v43, %v180_v45 }
 0x127   :  { %v146_v42 = vpop.f32.mrf.mxu1 }
 0x128   :  { %v147_v44 = vadd.f32 %v146_v42, %v96_v30 }
 0x12a   :  { %v154_v47 = vmax.f32 %v147_v44, 0.0 }
 0x12c   :  { %v182_v50 = vmul.f32 %v173_v34, %v154_v47 }
 0x12e   :  { %v185_v52 = vadd.f32 %v184_v49, %v182_v50 }
 0x130   :  { %v186_v53 = vadd.f32 %v185_v52, %v183_v51 }
 0x132   :  { %v187_v54 = vrot.slane %v186_v53, 4 }
 0x134   :  { %v188_v55 = vadd.f32 %v187_v54, %v186_v53 }
 0x136   :  { %v189_v56 = vrot.slane %v188_v55, 2 }
 0x138   :  { %v190_v57 = vadd.f32 %v189_v56, %v188_v55 }
 0x13a   :  { %v191_v58 = vrot.slane %v190_v57, 1 }
 0x13c   :  { %v192_v60 = vadd.f32 %v191_v58, %v190_v57 }
 0x13e   :  { %v195_v61 = vadd.f32 %v194_v59, %v192_v60 }
 0x140   :  { %196 = vst [vmem:[#allocation3] sm:$0x1] %v195_v61 }
 0x141   :  { %207 = dma.vmem_to_hbm [thread:$0]  %s203_s27, 16, %s205_s30, [#allocation4]  }
 0x142   :  { %262 = dma.done.wait [#allocation4], 16  }
 0x143   :  { %263 = vsyncadd [#allocation4], 4294967280 }
 0x144   :  { %212 = vsyncpa [#allocation4], 1 }

</bundles_post_ra>
